<compile_context>
chip_gen: v7x
topology: tpu7x:2x2x1
jax: 0.10.0
libtpu: 0.0.40
codegen_flags: <defaults>
</compile_context>

<pallas_src>
import jax
import jax.numpy as jnp
from jax import lax
from jax.experimental import pallas as pl
from jax.experimental.pallas import tpu as pltpu


def _round_up(x, m):
    return ((x + m - 1) // m) * m


def tgdp_kernel(img_ref, txt_ref, w1a_ref, w1b_ref, b1_ref, w2_ref, b2_ref,
                out_ref, h_ref):
    """Grid = (B_tiles, O_tiles).  h (hidden activation) is computed once per B tile."""

    @pl.when(pl.program_id(1) == 0)
    def _compute_hidden():
        img = img_ref[...].astype(jnp.float32)          # (TB, D)
        txt = txt_ref[...].astype(jnp.float32)          # (K, D)

        # attention logits over the K text features -- NT matmul (contract last dims),
        # no in-kernel transpose of txt.
        logits = lax.dot_general(img, txt, (((1,), (1,)), ((), ())),
                                 preferred_element_type=jnp.float32)   # (TB, K)

        # numerically stable softmax; denominator reciprocal on the EUP.
        m = jnp.max(logits, axis=-1, keepdims=True)
        e = jnp.exp(logits - m)
        inv = pl.reciprocal(jnp.sum(e, axis=-1, keepdims=True), approx=True)
        attn = e * inv                                                  # (TB, K)

        # weighted sum of text features.
        t_w = jnp.dot(attn, txt, preferred_element_type=jnp.float32)   # (TB, D)

        # first linear (split form of concat([img, t_w]) @ W1.T) + bias + ReLU.
        h = (jnp.dot(img, w1a_ref[...], preferred_element_type=jnp.float32)
             + jnp.dot(t_w, w1b_ref[...], preferred_element_type=jnp.float32)
             + b1_ref[...])                                             # (TB, H_sub)
        h_ref[...] = jnp.maximum(h, 0.0)

    # second linear: bf16 weight stream over the O axis, f32 accumulation.
    out = jnp.dot(h_ref[...].astype(jnp.bfloat16), w2_ref[...],
                  preferred_element_type=jnp.float32) + b2_ref[...]     # (TB, TILE_O)
    out_ref[...] = out.astype(out_ref.dtype)


def text_guided_deep_prompt(image_feat, text_features, params, *, depth, n_ctx, width):
    """JAX wrapper. Returns (B, depth, n_ctx, width) float32."""
    B, D = image_feat.shape
    K, _ = text_features.shape
    H = params["w1"].shape[0]
    O = params["w2"].shape[0]
    assert O == depth * n_ctx * width

    f32_b, bf16_b = 4, 2

    # ---- wrapper-side parameter prep (constant-foldable; no per-step kernel cost) ----
    # Contraction dim kept at the true hidden size (sublane-aligned only) -- no 128-pad.
    H_sub = _round_up(H, 8)
    w1_f32 = params["w1"].astype(jnp.float32)
    w1a_t = jnp.zeros((D, H_sub), jnp.float32).at[:, :H].set(w1_f32[:, :D].T)   # (D, Hs)
    w1b_t = jnp.zeros((D, H_sub), jnp.float32).at[:, :H].set(w1_f32[:, D:].T)   # (D, Hs)
    b1 = jnp.zeros((1, H_sub), jnp.float32).at[:, :H].set(
        params["b1"].astype(jnp.float32))

    # ---- tiling ----
    # B axis: tiles of up to 256 rows; small batches padded to a multiple of 8 rows
    # (unmasked stores, cleaner MXU feeds). Padding rows are zero and sliced off below.
    TILE_B = min(256, _round_up(B, 8))
    nB = pl.cdiv(B, TILE_B)
    B_pad = nB * TILE_B
    if B_pad != B:
        image_feat = jnp.pad(image_feat, ((0, B_pad - B), (0, 0)))

    # O axis: stream w2 / b2 / out in large lane-aligned tiles; pad O via cdiv tiling.
    TILE_O = 2048
    if O <= TILE_O:
        TILE_O = _round_up(O, 128)
    nO = pl.cdiv(O, TILE_O)
    O_pad = nO * TILE_O

    # Second-linear weight: (H_sub, O_pad), pre-transposed, streamed as bf16 (f32 accum
    # in-kernel). Bias stays f32 (negligible traffic, better numerics).
    w2_t = jnp.zeros((H_sub, O_pad), jnp.float32).at[:H, :O].set(
        params["w2"].astype(jnp.float32).T).astype(jnp.bfloat16)
    b2 = jnp.zeros((1, O_pad), jnp.float32).at[:, :O].set(
        params["b2"].reshape(1, O).astype(jnp.float32))

    # ---- explicit VMEM budget (double-buffered streamed operands + residents) ----
    vmem_need = (K * D * f32_b                       # text_features (resident)
                 + 2 * D * H_sub * f32_b             # w1a_t + w1b_t (resident)
                 + H_sub * f32_b                     # b1 (resident)
                 + TILE_B * H_sub * f32_b            # h scratch
                 + 2 * (TILE_B * D * f32_b           # image tile
                        + H_sub * TILE_O * bf16_b    # w2 tile (bf16 stream)
                        + TILE_O * f32_b             # b2 tile
                        + TILE_B * TILE_O * f32_b))  # out tile
    vmem_limit = int(min(64 * 2**20, max(32 * 2**20, 2 * vmem_need)))

    # ---- cost hint (actual streamed bytes: w2/b2 re-read once per B tile) ----
    flops = 2 * B_pad * (2 * D * K + 2 * D * H_sub) + 2 * B_pad * H_sub * O_pad
    bytes_accessed = (B_pad * D * f32_b + K * D * f32_b
                      + 2 * D * H_sub * f32_b + H_sub * f32_b
                      + nB * (H_sub * O_pad * bf16_b + O_pad * f32_b)
                      + B_pad * O_pad * f32_b)
    cost = pl.CostEstimate(flops=flops, transcendentals=B_pad * K,
                           bytes_accessed=bytes_accessed)

    out = pl.pallas_call(
        tgdp_kernel,
        out_shape=jax.ShapeDtypeStruct((B_pad, O_pad), jnp.float32),
        grid=(nB, nO),
        in_specs=[
            pl.BlockSpec((TILE_B, D), lambda i, o: (i, 0)),        # image_feat tile
            pl.BlockSpec((K, D), lambda i, o: (0, 0)),             # text_features (resident)
            pl.BlockSpec((D, H_sub), lambda i, o: (0, 0)),         # w1a_t (resident)
            pl.BlockSpec((D, H_sub), lambda i, o: (0, 0)),         # w1b_t (resident)
            pl.BlockSpec((1, H_sub), lambda i, o: (0, 0)),         # b1 (resident)
            pl.BlockSpec((H_sub, TILE_O), lambda i, o: (0, o)),    # w2_t bf16 (streamed)
            pl.BlockSpec((1, TILE_O), lambda i, o: (0, o)),        # b2 (streamed)
        ],
        out_specs=pl.BlockSpec((TILE_B, TILE_O), lambda i, o: (i, o)),
        scratch_shapes=[pltpu.VMEM((TILE_B, H_sub), jnp.float32)],  # h, carried across O
        compiler_params=pltpu.CompilerParams(
            dimension_semantics=("parallel", "arbitrary"),
            vmem_limit_bytes=vmem_limit),
        cost_estimate=cost,
    )(image_feat, text_features, w1a_t, w1b_t, b1, w2_t, b2)

    return out[:B, :O].reshape(B, depth, n_ctx, width)


if __name__ == "__main__":
    # Small shapes consistent with the module:
    #   image_feat (B, text_dim), text_features (n_classes, text_dim)
    B, D, K = 2, 32, 8                            # batch, text_dim, num text features
    depth, n_ctx, width, hidden = 2, 4, 64, 32    # PROMPT_DEPTH_VISION, N_CTX_VISION, visual width, hidden_dim
    O = depth * n_ctx * width

    key = jax.random.PRNGKey(0)
    k1, k2, k3, k4 = jax.random.split(key, 4)
    image_feat = jax.random.normal(k1, (B, D), jnp.float32)
    text_features = jax.random.normal(k2, (K, D), jnp.float32)

    # Deterministic synthetic parameters for the MLP (the only params used in forward).
    # TODO(synk): self.bonder (CrossAttnBlock) params exist in __init__ but are unused in forward; not materialized.
    params = {
        "w1": 0.02 * jax.random.normal(k3, (hidden, 2 * D), jnp.float32),   # Linear(2*text_dim -> hidden)
        "b1": jnp.zeros((hidden,), jnp.float32),
        "w2": 0.02 * jax.random.normal(k4, (O, hidden), jnp.float32),       # Linear(hidden -> depth*n_ctx*width)
        "b2": jnp.zeros((O,), jnp.float32),
    }

    out = text_guided_deep_prompt(image_feat, text_features, params,
                                  depth=depth, n_ctx=n_ctx, width=width)
    jax.block_until_ready(out)

    # Pure-JAX reference (approx softmax reciprocal + bf16 w2 stream -> loosened tol).
    logits = image_feat @ text_features.T
    attn = jax.nn.softmax(logits, axis=-1)
    t_w = attn @ text_features
    x_t = jnp.concatenate([image_feat, t_w], axis=-1)
    h = jnp.maximum(x_t @ params["w1"].T + params["b1"], 0.0)
    ref = (h @ params["w2"].T + params["b2"]).reshape(B, depth, n_ctx, width)

    assert out.shape == (B, depth, n_ctx, width)
    assert jnp.allclose(out, ref, atol=1e-2, rtol=1e-2), "mismatch vs reference"
    print("KERNEL_OK")
</pallas_src>

<mosaic_0001>
module attributes {stable_mosaic.version = 11 : i64} {
  func.func @tgdp_kernel(%arg0: i32, %arg1: i32, %arg2: memref<8x32xf32, #tpu.memory_space<vmem>>, %arg3: memref<8x32xf32, #tpu.memory_space<vmem>>, %arg4: memref<32x32xf32, #tpu.memory_space<vmem>>, %arg5: memref<32x32xf32, #tpu.memory_space<vmem>>, %arg6: memref<1x32xf32, #tpu.memory_space<vmem>>, %arg7: memref<32x512xbf16, #tpu.memory_space<vmem>>, %arg8: memref<1x512xf32, #tpu.memory_space<vmem>>, %arg9: memref<8x512xf32, #tpu.memory_space<vmem>>, %arg10: memref<8x32xf32, #tpu.memory_space<vmem>>) attributes {dimension_semantics = [#tpu.dimension_semantics<parallel>, #tpu.dimension_semantics<arbitrary>], iteration_bounds = array<i64: 1, 1>, scalar_prefetch = 0 : i64, scratch_operands = 1 : i64, tpu.core_type = #tpu.core_type<tc>, window_params = [{transform_indices = @transform_0, window_bounds = array<i64: 8, 32>}, {pipeline_mode = #tpu.pipeline_mode<synchronous>, transform_indices = @transform_1, window_bounds = array<i64: 8, 32>}, {pipeline_mode = #tpu.pipeline_mode<synchronous>, transform_indices = @transform_2, window_bounds = array<i64: 32, 32>}, {pipeline_mode = #tpu.pipeline_mode<synchronous>, transform_indices = @transform_3, window_bounds = array<i64: 32, 32>}, {pipeline_mode = #tpu.pipeline_mode<synchronous>, transform_indices = @transform_4, window_bounds = array<i64: 1, 32>}, {transform_indices = @transform_5, window_bounds = array<i64: 32, 512>}, {transform_indices = @transform_6, window_bounds = array<i64: 1, 512>}, {transform_indices = @transform_7, window_bounds = array<i64: 8, 512>}]} {
    %c0_i32 = arith.constant 0 : i32
    %0 = arith.cmpi eq, %arg1, %c0_i32 : i32
    %1 = arith.extui %0 : i1 to i32
    %c0_i32_0 = arith.constant 0 : i32
    %2 = arith.cmpi ne, %1, %c0_i32_0 : i32
    scf.if %2 {
      %c0_8 = arith.constant 0 : index
      %c0_9 = arith.constant 0 : index
      %11 = vector.load %arg2[%c0_8, %c0_9] : memref<8x32xf32, #tpu.memory_space<vmem>>, vector<8x32xf32>
      %c0_10 = arith.constant 0 : index
      %c0_11 = arith.constant 0 : index
      %12 = vector.load %arg3[%c0_10, %c0_11] : memref<8x32xf32, #tpu.memory_space<vmem>>, vector<8x32xf32>
      %cst_12 = arith.constant dense<0.000000e+00> : vector<8x8xf32>
      %13 = tpu.matmul %11, %12, %cst_12 {dimension_numbers = #tpu.dot_dimension_numbers<[1], [1], [0], [0], [0, 0, 1, 0], [], []>} : vector<8x32xf32>, vector<8x32xf32>, vector<8x8xf32> -> vector<8x8xf32>
      %cst_13 = arith.constant dense<0xFF800000> : vector<8xf32>
      %14 = vector.multi_reduction <maximumf>, %13, %cst_13 [1] : vector<8x8xf32> to vector<8xf32>
      %15 = vector.shape_cast %14 : vector<8xf32> to vector<8x1xf32>
      %16 = vector.broadcast %15 : vector<8x1xf32> to vector<8x8xf32>
      %17 = arith.subf %13, %16 : vector<8x8xf32>
      %18 = math.exp %17 : vector<8x8xf32>
      %cst_14 = arith.constant dense<0.000000e+00> : vector<8xf32>
      %19 = vector.multi_reduction <add>, %18, %cst_14 [1] : vector<8x8xf32> to vector<8xf32>
      %20 = vector.shape_cast %19 : vector<8xf32> to vector<8x1xf32>
      %21 = tpu.reciprocal %20 {approx = true} : vector<8x1xf32> -> vector<8x1xf32>
      %22 = vector.broadcast %21 : vector<8x1xf32> to vector<8x8xf32>
      %23 = arith.mulf %18, %22 : vector<8x8xf32>
      %cst_15 = arith.constant dense<0.000000e+00> : vector<8x32xf32>
      %24 = tpu.matmul %23, %12, %cst_15 {dimension_numbers = #tpu.dot_dimension_numbers<[1], [0], [0], [1], [0, 0, 1, 1], [], []>} : vector<8x8xf32>, vector<8x32xf32>, vector<8x32xf32> -> vector<8x32xf32>
      %c0_16 = arith.constant 0 : index
      %c0_17 = arith.constant 0 : index
      %25 = vector.load %arg4[%c0_16, %c0_17] : memref<32x32xf32, #tpu.memory_space<vmem>>, vector<32x32xf32>
      %cst_18 = arith.constant dense<0.000000e+00> : vector<8x32xf32>
      %26 = tpu.matmul %11, %25, %cst_18 {dimension_numbers = #tpu.dot_dimension_numbers<[1], [0], [0], [1], [0, 0, 1, 1], [], []>} : vector<8x32xf32>, vector<32x32xf32>, vector<8x32xf32> -> vector<8x32xf32>
      %c0_19 = arith.constant 0 : index
      %c0_20 = arith.constant 0 : index
      %27 = vector.load %arg5[%c0_19, %c0_20] : memref<32x32xf32, #tpu.memory_space<vmem>>, vector<32x32xf32>
      %cst_21 = arith.constant dense<0.000000e+00> : vector<8x32xf32>
      %28 = tpu.matmul %24, %27, %cst_21 {dimension_numbers = #tpu.dot_dimension_numbers<[1], [0], [0], [1], [0, 0, 1, 1], [], []>} : vector<8x32xf32>, vector<32x32xf32>, vector<8x32xf32> -> vector<8x32xf32>
      %29 = arith.addf %26, %28 : vector<8x32xf32>
      %c0_22 = arith.constant 0 : index
      %c0_23 = arith.constant 0 : index
      %30 = vector.load %arg6[%c0_22, %c0_23] : memref<1x32xf32, #tpu.memory_space<vmem>>, vector<1x32xf32>
      %31 = vector.broadcast %30 : vector<1x32xf32> to vector<8x32xf32>
      %32 = arith.addf %29, %31 : vector<8x32xf32>
      %cst_24 = arith.constant 0.000000e+00 : f32
      %33 = vector.broadcast %cst_24 : f32 to vector<8x32xf32>
      %34 = arith.maximumf %32, %33 : vector<8x32xf32>
      %c0_25 = arith.constant 0 : index
      %c0_26 = arith.constant 0 : index
      %35 = vector.load %arg10[%c0_25, %c0_26] : memref<8x32xf32, #tpu.memory_space<vmem>>, vector<8x32xf32>
      tpu.vector_store %arg10[%c0_25, %c0_26], %34 {strides = array<i32>} : memref<8x32xf32, #tpu.memory_space<vmem>>, vector<8x32xf32>,
    } else {
    }
    %c0 = arith.constant 0 : index
    %c0_1 = arith.constant 0 : index
    %3 = vector.load %arg10[%c0, %c0_1] : memref<8x32xf32, #tpu.memory_space<vmem>>, vector<8x32xf32>
    %4 = arith.truncf %3 : vector<8x32xf32> to vector<8x32xbf16>
    %c0_2 = arith.constant 0 : index
    %c0_3 = arith.constant 0 : index
    %5 = vector.load %arg7[%c0_2, %c0_3] : memref<32x512xbf16, #tpu.memory_space<vmem>>, vector<32x512xbf16>
    %cst = arith.constant dense<0.000000e+00> : vector<8x512xf32>
    %6 = tpu.matmul %4, %5, %cst {dimension_numbers = #tpu.dot_dimension_numbers<[1], [0], [0], [1], [0, 0, 1, 1], [], []>} : vector<8x32xbf16>, vector<32x512xbf16>, vector<8x512xf32> -> vector<8x512xf32>
    %c0_4 = arith.constant 0 : index
    %c0_5 = arith.constant 0 : index
    %7 = vector.load %arg8[%c0_4, %c0_5] : memref<1x512xf32, #tpu.memory_space<vmem>>, vector<1x512xf32>
    %8 = vector.broadcast %7 : vector<1x512xf32> to vector<8x512xf32>
    %9 = arith.addf %6, %8 : vector<8x512xf32>
    %c0_6 = arith.constant 0 : index
    %c0_7 = arith.constant 0 : index
    %10 = vector.load %arg9[%c0_6, %c0_7] : memref<8x512xf32, #tpu.memory_space<vmem>>, vector<8x512xf32>
    tpu.vector_store %arg9[%c0_6, %c0_7], %9 {strides = array<i32>} : memref<8x512xf32, #tpu.memory_space<vmem>>, vector<8x512xf32>,
    return
  }
  func.func @transform_0(%arg0: i32, %arg1: i32) -> (i32, i32) {
    %c0_i32 = arith.constant 0 : i32
    %c0_i32_0 = arith.constant 0 : i32
    return %arg0, %c0_i32 : i32, i32
  }
  func.func @transform_1(%arg0: i32, %arg1: i32) -> (i32, i32) {
    %c0_i32 = arith.constant 0 : i32
    %c0_i32_0 = arith.constant 0 : i32
    %c0_i32_1 = arith.constant 0 : i32
    return %c0_i32, %c0_i32_0 : i32, i32
  }
  func.func @transform_2(%arg0: i32, %arg1: i32) -> (i32, i32) {
    %c0_i32 = arith.constant 0 : i32
    %c0_i32_0 = arith.constant 0 : i32
    %c0_i32_1 = arith.constant 0 : i32
    return %c0_i32, %c0_i32_0 : i32, i32
  }
  func.func @transform_3(%arg0: i32, %arg1: i32) -> (i32, i32) {
    %c0_i32 = arith.constant 0 : i32
    %c0_i32_0 = arith.constant 0 : i32
    %c0_i32_1 = arith.constant 0 : i32
    return %c0_i32, %c0_i32_0 : i32, i32
  }
  func.func @transform_4(%arg0: i32, %arg1: i32) -> (i32, i32) {
    %c0_i32 = arith.constant 0 : i32
    %c0_i32_0 = arith.constant 0 : i32
    %c0_i32_1 = arith.constant 0 : i32
    return %c0_i32, %c0_i32_0 : i32, i32
  }
  func.func @transform_5(%arg0: i32, %arg1: i32) -> (i32, i32) {
    %c0_i32 = arith.constant 0 : i32
    %c0_i32_0 = arith.constant 0 : i32
    return %c0_i32, %arg1 : i32, i32
  }
  func.func @transform_6(%arg0: i32, %arg1: i32) -> (i32, i32) {
    %c0_i32 = arith.constant 0 : i32
    %c0_i32_0 = arith.constant 0 : i32
    return %c0_i32, %arg1 : i32, i32
  }
  func.func @transform_7(%arg0: i32, %arg1: i32) -> (i32, i32) {
    %c0_i32 = arith.constant 0 : i32
    return %arg0, %arg1 : i32, i32
  }
}

</mosaic_0001>

<bundles_post_ra>
// kernel: tpu_custom_call.1
= control target key start
LH: loop header
LB: loop body
LE: loop exit
PB: predicated region body
PF: predicated region fallthrough
CT: control target
= control target key end

     0   :  { %12 = vsyncpa [#allocation4], 0  ;;  %s996_s0 = inlined_call_operand.hbm [shape: f32[8,32], index: 0, kind: input, shape index: {}]   ;;  %s997_s1 = inlined_call_operand.hbm [shape: f32[8,32], index: 1, kind: input, shape index: {}]   ;;  %s998_s2 = inlined_call_operand.hbm [shape: f32[32,32], index: 2, kind: input, shape index: {}]   ;;  %s999_s3 = inlined_call_operand.hbm [shape: f32[32,32], index: 3, kind: input, shape index: {}]   ;;  %s1000_s4 = inlined_call_operand.vmem [shape: f32[1,32], index: 4, kind: input, shape index: {}]   ;;  %s1001_s5 = inlined_call_operand.hbm [shape: bf16[32,512], index: 5, kind: input, shape index: {}]   ;;  %s1002_s6 = inlined_call_operand.vmem [shape: f32[1,512], index: 6, kind: input, shape index: {}]   ;;  %s1003_s7 = inlined_call_operand.hbm [shape: f32[8,512], index: 7, kind: output, shape index: {}]  }
   0x1   :  { %13 = vsyncpa [#allocation7], 0 }
   0x2   :  { %14 = vsyncpa [#allocation10], 0 }
   0x3   :  { %15 = vsyncpa [#allocation5], 0  ;;  %s844_s24 = smov [#allocation6]   ;;  %s704_s28 = scalar_lea.hbm %s997_s1, 128 }
   0x4   :  { %s32_s25 = sshll.u32 %s844_s24, 4  ;;  %p705_p0 = scmp.ne.s32.totalorder %s997_s1, %s704_s28  ;;  %s33_s25 = int_to_ptr.vmem [resolvable:$true] %s32_s25 }
   0x5   :  { %p708_p1 = scmp.lt.u32.totalorder %s704_s28, %s997_s1 }
   0x7   :  { %p710_p2 = pnand %p708_p1, %p705_p0 }
   0x9   :  { %713 = shalt.err (!%p710_p2)
}
   0xa   :  { %s714_s10 = scalar_lea.vmem %s33_s25, 128  ;;  %p719_p4 = scmp.lt.s32.totalorder %s33_s25, %s33_s25 }
   0xb   :  { %p715_p3 = scmp.ne.s32.totalorder %s33_s25, %s714_s10  ;;  %p720_p5 = scmp.lt.s32.totalorder %s714_s10, %s714_s10 }
   0xd   :  { %p721_p6 = por %p720_p5, %p719_p4 }
   0xf   :  { %p722_p7 = pnand %p721_p6, %p715_p3 }
  0x11   :  { %725 = shalt.err (!%p722_p7)
}
  0x12   :  { %35 = dma.hbm_to_vmem [thread:$0]  %s997_s1, 128, %s33_s25, [#allocation7]  }
  0x13   :  { %s845_s13 = smov [#allocation9]   ;;  %s846_s15 = smov [#allocation3]  }
  0x14   :  { %s53_s14 = sshll.u32 %s845_s13, 4  ;;  %s22_s16 = sshll.u32 %s846_s15, 4  ;;  %s54_s14 = int_to_ptr.vmem [resolvable:$true] %s53_s14  ;;  %s23_s16 = int_to_ptr.vmem [resolvable:$true] %s22_s16 }
  0x15   :  { %s726_s19 = scalar_lea.hbm %s999_s3, 512 }
  0x16   :  { %p727_p8 = scmp.ne.s32.totalorder %s999_s3, %s726_s19  ;;  %p730_p9 = scmp.lt.u32.totalorder %s726_s19, %s999_s3 }
  0x18   :  { %p732_p10 = pnand %p730_p9, %p727_p8 }
  0x1a   :  { %735 = shalt.err (!%p732_p10)
}
  0x1b   :  { %s736_s1 = scalar_lea.vmem %s54_s14, 512  ;;  %p741_p12 = scmp.lt.s32.totalorder %s54_s14, %s54_s14 }
  0x1c   :  { %p737_p11 = scmp.ne.s32.totalorder %s54_s14, %s736_s1  ;;  %p742_p13 = scmp.lt.s32.totalorder %s736_s1, %s736_s1 }
  0x1e   :  { %p743_p0 = por %p742_p13, %p741_p12 }
  0x20   :  { %p744_p1 = pnand %p743_p0, %p737_p11 }
  0x22   :  { %747 = shalt.err (!%p744_p1)
}
  0x23   :  { %s847_s24 = smov 128   ;;  %s848_s25 = smov 8  }
  0x24   :  { %59 = dma.hbm_to_vmem [thread:$0]  %s999_s3, 512, %s54_s14, [#allocation10], %s847_s24, %s847_s24, %s848_s25  }
  0x25   :  { %s748_s30 = scalar_lea.hbm %s996_s0, 128 }
  0x26   :  { %p749_p2 = scmp.ne.s32.totalorder %s996_s0, %s748_s30  ;;  %p752_p3 = scmp.lt.u32.totalorder %s748_s30, %s996_s0 }
  0x28   :  { %p754_p4 = pnand %p752_p3, %p749_p2 }
  0x2a   :  { %757 = shalt.err (!%p754_p4)
}
  0x2b   :  { %s758_s12 = scalar_lea.vmem %s23_s16, 128  ;;  %p763_p6 = scmp.lt.s32.totalorder %s23_s16, %s23_s16 }
  0x2c   :  { %p759_p5 = scmp.ne.s32.totalorder %s23_s16, %s758_s12  ;;  %p764_p7 = scmp.lt.s32.totalorder %s758_s12, %s758_s12 }
  0x2e   :  { %p765_p8 = por %p764_p7, %p763_p6 }
  0x30   :  { %p766_p9 = pnand %p765_p8, %p759_p5 }
  0x32   :  { %769 = shalt.err (!%p766_p9)
}
  0x33   :  { %25 = dma.hbm_to_vmem [thread:$0]  %s996_s0, 128, %s23_s16, [#allocation4]  }
  0x34   :  { %s849_s14 = smov [#allocation8]   ;;  %s850_s17 = smov [#allocation11]  }
  0x35   :  { %s41_s15 = sshll.u32 %s849_s14, 4  ;;  %s67_s18 = sshll.u32 %s850_s17, 4  ;;  %s42_s15 = int_to_ptr.vmem [resolvable:$true] %s41_s15  ;;  %s68_s18 = int_to_ptr.vmem [resolvable:$true] %s67_s18 }
  0x36   :  { %s770_s21 = scalar_lea.hbm %s998_s2, 512 }
  0x37   :  { %p771_p10 = scmp.ne.s32.totalorder %s998_s2, %s770_s21  ;;  %p774_p11 = scmp.lt.u32.totalorder %s770_s21, %s998_s2 }
  0x39   :  { %p776_p12 = pnand %p774_p11, %p771_p10 }
  0x3b   :  { %779 = shalt.err (!%p776_p12)
}
  0x3c   :  { %s780_s0 = scalar_lea.vmem %s42_s15, 512  ;;  %p785_p0 = scmp.lt.s32.totalorder %s42_s15, %s42_s15 }
  0x3d   :  { %p781_p13 = scmp.ne.s32.totalorder %s42_s15, %s780_s0  ;;  %p786_p1 = scmp.lt.s32.totalorder %s780_s0, %s780_s0 }
  0x3f   :  { %p787_p2 = por %p786_p1, %p785_p0 }
  0x41   :  { %p788_p3 = pnand %p787_p2, %p781_p13 }
  0x43   :  { %791 = shalt.err (!%p788_p3)
}
  0x44   :  { %47 = dma.hbm_to_vmem [thread:$0]  %s998_s2, 512, %s42_s15, [#allocation7], %s847_s24, %s847_s24, %s848_s25  }
  0x45   :  { %s792_s30 = scalar_lea.hbm %s1001_s5, 1024 }
  0x46   :  { %p793_p4 = scmp.ne.s32.totalorder %s1001_s5, %s792_s30  ;;  %p796_p5 = scmp.lt.u32.totalorder %s792_s30, %s1001_s5 }
  0x48   :  { %p798_p6 = pnand %p796_p5, %p793_p4 }
  0x4a   :  { %801 = shalt.err (!%p798_p6)
}
  0x4b   :  { %s802_s12 = scalar_lea.vmem %s68_s18, 1024  ;;  %p807_p8 = scmp.lt.s32.totalorder %s68_s18, %s68_s18 }
  0x4c   :  { %p803_p7 = scmp.ne.s32.totalorder %s68_s18, %s802_s12  ;;  %p808_p9 = scmp.lt.s32.totalorder %s802_s12, %s802_s12 }
  0x4e   :  { %p809_p10 = por %p808_p9, %p807_p8 }
  0x50   :  { %p810_p11 = pnand %p809_p10, %p803_p7 }
  0x52   :  { %813 = shalt.err (!%p810_p11)
}
  0x53   :  { %s851_s2 = smov 256   ;;  %s852_s24 = smov 16  }
  0x54   :  { %73 = dma.hbm_to_vmem [thread:$0]  %s1001_s5, 1024, %s68_s18, [#allocation10], %s851_s2, %s851_s2, %s852_s24  }
  0x55   :  { %836 = dma.done.wait [#allocation4], 128  }
  0x56   :  { %837 = vsyncadd [#allocation4], 4294967168 }
  0x57   :  { %838 = dma.done.wait [#allocation7], 640  }
  0x58   :  { %839 = vsyncadd [#allocation7], 4294966656 }
  0x59   :  { %840 = dma.done.wait [#allocation10], 1536  }
  0x5a   :  { %841 = vsyncadd [#allocation10], 4294965760  ;;  %v853_v0 = vmov 0.0   ;;  %vm854_vm0 = vmmov 0   ;;  %vm98_vm1 = vcmask 261120   ;;  %v97_v1 = vld [vmem:[#allocation6] sm:$0xff]  ;;  %v433_v48 = vlaneseq }
  0x5b   :  { %630 = vmatprep.subr.mxu0 %v853_v0  ;;  %632 = vmatprep.mubr.msk.f32.mxu0 %vm854_vm0, %v853_v0  ;;  %v96_v2 = vld [vmem:[#allocation3] sm:$0xff]  ;;  %vm175_vm2 = vcmask 64512   ;;  %v260_v11 = vld [vmem:[#allocation8] sm:$0xff]  ;;  %v261_v12 = vld [vmem:[#allocation8 + $0x8] sm:$0xff]  ;;  %v855_v13 = vmov 0.0|0.0   ;;  %v856_v39 = vmov 0  }
  0x5c   :  { %635 = vmatprep.subr.mxu1 %v853_v0  ;;  %637 = vmatprep.mubr.msk.f32.mxu1 %vm854_vm0, %v853_v0  ;;  %v669_v14 = vpack.c.bf16 %v261_v12, %v260_v11  ;;  %v262_v15 = vld [vmem:[#allocation8 + $0x10] sm:$0xff]  ;;  %v263_v16 = vld [vmem:[#allocation8 + $0x18] sm:$0xff]  ;;  %v264_v19 = vld [vmem:[#allocation9] sm:$0xff]  ;;  %v434_v49 = vshrl.u32 %v433_v48, 7 }
  0x5d   :  { %631 = vmatpush3.xpose.msk.msra.mxu0 %vm98_vm1, %v97_v1  ;;  %636 = vmatpush3.msra.mxu1 %v97_v1  ;;  %v672_v17 = vpack.c.bf16 %v263_v16, %v262_v15  ;;  %v265_v20 = vld [vmem:[#allocation9 + $0x8] sm:$0xff]  ;;  %v266_v24 = vld [vmem:[#allocation9 + $0x10] sm:$0xff]  ;;  %v267_v25 = vld [vmem:[#allocation9 + $0x18] sm:$0xff] }
  0x5e   :  { %668 = vmatprep.subr.bf16.mxu0 %v855_v13  ;;  %662 = vmatprep.subr.bf16.mxu1 %v855_v13  ;;  %v663_v22 = vpack.c.bf16 %v265_v20, %v264_v19  ;;  %v666_v26 = vpack.c.bf16 %v267_v25, %v266_v24  ;;  %v688_v31 = vld [vmem:[#allocation11] ss:$16 sps:$4 sm:$0xff]   ;;  %v690_v32 = vld [vmem:[#allocation11 + $0x4] ss:$16 sps:$4 sm:$0xff]   ;;  %v691_v33 = vld [vmem:[#allocation11 + $0x8] ss:$16 sps:$4 sm:$0xff]  }
  0x5f   :  { %v693_v34 = vld [vmem:[#allocation11 + $0xc] ss:$16 sps:$4 sm:$0xff]   ;;  %v696_v35 = vld [vmem:[#allocation11 + $0x24] ss:$16 sps:$4 sm:$0xff]   ;;  %v694_v37 = vld [vmem:[#allocation11 + $0x20] ss:$16 sps:$4 sm:$0xff]  }
  0x60   :  { %633 = vmatmul.mubr.msk.f32.vlgmr.msra.gmra.mrb[0].mxu0 %vm98_vm1, %v96_v2  ;;  %v699_v36 = vld [vmem:[#allocation11 + $0x2c] ss:$16 sps:$4 sm:$0xff]   ;;  %v697_v38 = vld [vmem:[#allocation11 + $0x28] ss:$16 sps:$4 sm:$0xff]   ;;  %v435_v50 = vsub.s32 0, %v434_v49  ;;  %v443_v51 = vsub.s32 2, %v434_v49 }
  0x61   :  { %659 = vmatprep.mubr.msk.f32.mxu0 %vm854_vm0, %v853_v0  ;;  %670 = vmatpush3.bf16.msra.mxu0 %v669_v14  ;;  %v605_v41 = vld [vmem:[%s1000_s4] ss:$0 sm:$0xff]  ;;  %v439_v53 = vsub.s32 1, %v434_v49  ;;  %v447_v54 = vsub.s32 3, %v434_v49  ;;  %s857_s4 = smov [#allocation12]  }
  0x62   :  { %671 = vmatprep.subr.bf16.mxu0 %v855_v13  ;;  %v431_v52 = vld [vmem:[%s1002_s6] sm:$0xf]  ;;  %s589_s17 = sshll.u32 %s857_s4, 4  ;;  %s590_s17 = int_to_ptr.vmem [resolvable:$true] %s589_s17 }
  0x63   :  { %v436_v55 = vrot.slane %v431_v52, %v435_v50  ;;  %v444_v56 = vrot.slane %v431_v52, %v443_v51  ;;  %v440_v57 = vrot.slane %v431_v52, %v439_v53  ;;  %v448_v58 = vrot.slane %v431_v52, %v447_v54  ;;  %s814_s6 = scalar_lea.vmem %s590_s17, 512  ;;  %p819_p13 = scmp.lt.s32.totalorder %s590_s17, %s590_s17 }
  0x64   :  { %p815_p12 = scmp.ne.s32.totalorder %s590_s17, %s814_s6  ;;  %p820_p0 = scmp.lt.s32.totalorder %s814_s6, %s814_s6 }
  0x65   :  { %673 = vmatpush3.bf16.msra.mxu0 %v672_v17 }
  0x66   :  { %538 = vmatprep.subr.bf16.mxu0 %v693_v34  ;;  %p821_p1 = por %p820_p0, %p819_p13 }
  0x68   :  { %660 = vmatmul.mubr.msk.f32.vlgmr.msra.gmra.mrb[2].mxu0 %vm98_vm1, %v96_v2  ;;  %p822_p2 = pnand %p821_p1, %p815_p12 }
  0x69   :  { %539 = vmatpush1.bf16.msra.mxu0 %v691_v33  ;;  %570 = vmatprep.mubr.bf16.mxu0 %v856_v39 }
  0x6a   :  { %540 = vmatprep.subr.bf16.mxu0 %v699_v36 }
  0x6d   :  { %541 = vmatpush1.bf16.msra.mxu0 %v697_v38 }
 0x133   :  { %v171_v3 = vpop.f32.mrb[0].mxu0 }
 0x134   :  { %v634_v4 = vpop.f32.mrb[1].mxu0  ;;  %v176_v5 = vsel %vm175_vm2, %v171_v3, -inf }
 0x135   :  { %177 = vmax.xlane.f32.xlu0 %v176_v5 }
 0x13b   :  { %v407_v27 = vpop.f32.mrb[2].mxu0 }
 0x13c   :  { %v661_v28 = vpop.f32.mrb[3].mxu0 }
 0x1c2   :  { %v178_v6 = vpop.xlane.xlu0 %177 }
 0x1c3   :  { %v179_v7 = vsub.f32 %v171_v3, %v178_v6 }
 0x1c5   :  { %v180_v8 = vmul.f32 1.442695, %v179_v7 }
 0x1c7   :  { %700 = vpow2.f32 %v180_v8 }
 0x1d1   :  { %v701_v9 = vpop.eup %700 }
 0x1d2   :  { %v182_v10 = vsel %vm175_vm2, %v701_v9, 0.0 }
 0x1d3   :  { %183 = vadd.xlane.f32.xlu0 %v182_v10 }
 0x260   :  { %v184_v18 = vpop.xlane.xlu0 %183 }
 0x261   :  { %702 = vrcp.f32 %v184_v18 }
 0x26b   :  { %v703_v21 = vpop.eup %702 }
 0x26c   :  { %v186_v23 = vmul.f32 %v703_v21, %v701_v9 }
 0x26e   :  { %638 = vmatmul.mubr.msk.f32.vlgmr.msra.gmra.mrb[0].mxu1 %vm175_vm2, %v186_v23 }
 0x26f   :  { %664 = vmatpush3.bf16.msra.mxu1 %v663_v22  ;;  %648 = vmatprep.mubr.msk.f32.mxu1 %vm854_vm0, %v853_v0 }
 0x270   :  { %665 = vmatprep.subr.bf16.mxu1 %v855_v13 }
 0x273   :  { %667 = vmatpush3.bf16.msra.mxu1 %v666_v26 }
 0x274   :  { %497 = vmatprep.subr.bf16.mxu1 %v690_v32 }
 0x341   :  { %v256_v29 = vpop.f32.mrb[0].mxu1 }
 0x342   :  { %v639_v30 = vpop.f32.mrb[1].mxu1  ;;  %649 = vmatmul.mubr.msk.f32.vlgmr.msra.gmra.mrb[2].mxu1 %vm98_vm1, %v256_v29 }
 0x343   :  { %498 = vmatpush1.bf16.msra.mxu1 %v688_v31  ;;  %529 = vmatprep.mubr.bf16.mxu1 %v856_v39 }
 0x344   :  { %499 = vmatprep.subr.bf16.mxu1 %v696_v35 }
 0x347   :  { %500 = vmatpush1.bf16.msra.mxu1 %v694_v37 }
 0x415   :  { %v337_v40 = vpop.f32.mrb[2].mxu1 }
 0x416   :  { %v408_v42 = vadd.f32 %v407_v27, %v337_v40  ;;  %v650_v43 = vpop.f32.mrb[3].mxu1 }
 0x418   :  { %v418_v44 = vadd.f32 %v605_v41, %v408_v42 }
 0x41a   :  { %v419_v45 = vmax.f32 %v418_v44, 0.0 }
 0x41c   :  { %420 = vst.msk [vmem:[#allocation2] sm:$0xff] %vm98_vm1, %v419_v45 }
 0x423   :  { %v421_v46 = vld [vmem:[#allocation2] sm:$0xff] }
 0x424   :  { %v422_v47 = vpack.c.bf16 %v421_v46, %v421_v46 }
 0x426   :  { %614 = vmatmul.mubr.msk.bf16.vlgmr.msra.gmra.mrb[4].mxu1 %vm98_vm1, %v422_v47  ;;  %615 = vmatmul.mubr.msk.bf16.vlgmr.msra.gmra.mrb[4].mxu0 %vm98_vm1, %v422_v47 }
 0x4f9   :  { %v531_v59 = vpop.f32.mrb[4].mxu1  ;;  %v572_v60 = vpop.f32.mrb[4].mxu0 }
 0x4fa   :  { %v532_v61 = vadd.f32 %v531_v59, %v436_v55  ;;  %v573_v62 = vadd.f32 %v572_v60, %v444_v56  ;;  %v533_v63 = vpop.f32.mrb[5].mxu1  ;;  %v574_v0 = vpop.f32.mrb[5].mxu0 }
 0x4fb   :  { %v534_v1 = vadd.f32 %v533_v63, %v440_v57  ;;  %v575_v2 = vadd.f32 %v574_v0, %v448_v58  ;;  %v535_v3 = vpop.f32.mrb[6].mxu1  ;;  %v576_v4 = vpop.f32.mrb[6].mxu0 }
 0x4fc   :  { %579 = vst [vmem:[#allocation12] sm:$0xff] %v532_v61  ;;  %581 = vst [vmem:[#allocation12 + $0x10] sm:$0xff] %v573_v62  ;;  %v536_v5 = vpop.f32.mrb[7].mxu1  ;;  %v577_v6 = vpop.f32.mrb[7].mxu0 }
 0x4fd   :  { %580 = vst [vmem:[#allocation12 + $0x8] sm:$0xff] %v534_v1  ;;  %582 = vst [vmem:[#allocation12 + $0x18] sm:$0xff] %v575_v2 }
 0x4fe   :  { %825 = shalt.err (!%p822_p2)
}
 0x4ff   :  { %s826_s20 = scalar_lea.hbm %s1003_s7, 512 }
 0x500   :  { %p827_p3 = scmp.ne.s32.totalorder %s1003_s7, %s826_s20  ;;  %p830_p4 = scmp.lt.u32.totalorder %s826_s20, %s1003_s7 }
 0x502   :  { %p832_p5 = pnand %p830_p4, %p827_p3 }
 0x504   :  { %835 = shalt.err (!%p832_p5)
}
 0x505   :  { %592 = dma.vmem_to_hbm [thread:$0]  %s590_s17, 512, %s1003_s7, [#allocation5]  }
 0x506   :  { %842 = dma.done.wait [#allocation5], 512  }
 0x507   :  { %843 = vsyncadd [#allocation5], 4294966784 }
 0x508   :  { %596 = vsyncpa [#allocation4], 1 }
 0x509   :  { %597 = vsyncpa [#allocation7], 1 }
 0x50a   :  { %598 = vsyncpa [#allocation10], 1 }
 0x50b   :  { %599 = vsyncpa [#allocation5], 1 }

</bundles_post_ra>
